<compile_context>
chip_gen: v7x
topology: tpu7x:2x2x1
jax: 0.10.0
libtpu: 0.0.40
codegen_flags: <defaults>
</compile_context>

<pallas_src>
import functools

import jax
import jax.numpy as jnp
from jax.experimental import pallas as pl
from jax.experimental.pallas import tpu as pltpu

_SQRT_HALF = 0.7071067811865476
_LN_EPS = 1e-5


def _latent_classifier_kernel(z_ref, w1t_ref, b1_ref, g_ref, beta_ref,
                              w2_ref, b2_ref, out_ref):
    # z_ref  : (TB, D)  natural-layout batch tile (streamed, double-buffered)
    # w1t_ref: (H, D)   first Linear weight, pre-transposed, grid-resident
    # b1/g/beta/w2 refs: (H, 1) params, broadcast along the lane (batch) axis
    # b2_ref : (1, 1)   scalar in SMEM
    # out_ref: (1, TB)  lane-dense sigmoid output

    # ---- Linear 1 on the MXU as a transposed-RHS contraction:
    #      (H, D) x (TB, D) contracting D -> (H, TB).  Batch stays on lanes;
    #      the operand transpose happens on-chip instead of as an HBM relayout.
    h = jax.lax.dot_general(
        w1t_ref[...], z_ref[...],
        dimension_numbers=(((1,), (1,)), ((), ())),
        preferred_element_type=jnp.float32,
        precision=jax.lax.Precision.HIGHEST,
    ) + b1_ref[...]

    # ---- LayerNorm over the hidden dim (sublane axis), eps = 1e-5, affine.
    mean = jnp.mean(h, axis=0, keepdims=True)
    cent = h - mean
    var = jnp.mean(cent * cent, axis=0, keepdims=True)
    hn = cent * jax.lax.rsqrt(var + _LN_EPS)
    hn = hn * g_ref[...] + beta_ref[...]

    # ---- GELU (exact / erf form, PyTorch nn.GELU default).
    act = 0.5 * hn * (1.0 + jax.lax.erf(hn * jnp.float32(_SQRT_HALF)))

    # Dropout: identity in eval mode.

    # ---- Linear 2 (out_features = 1): VPU multiply + sublane reduce instead
    #      of an N=1 MXU matmul, then bias + sigmoid; lane-dense store.
    logits = jnp.sum(act * w2_ref[...], axis=0, keepdims=True) + b2_ref[0, 0]
    out_ref[...] = jax.nn.sigmoid(logits).astype(out_ref.dtype)


def _choose_batch_tile(B, D):
    """Adaptive batch tile: ~2 MiB (lane-padded) per streamed z tile."""
    lane = 128
    d_pad = -(-D // lane) * lane                    # VMEM lane-padded row width
    tb = max(lane, ((2 * 1024 * 1024) // (d_pad * 4)) // lane * lane)
    # v7x megacore: keep >= 2 grid tiles for non-trivial batches so the
    # "parallel" grid axis can be sharded across both TensorCores.
    if B > 256:
        half = (-(-B // 2) + lane - 1) // lane * lane
        tb = min(tb, half)
    if tb >= B:
        return B, 1                                  # single full-batch tile
    return tb, -(-B // tb)                           # cdiv; trailing tile partial


@functools.partial(jax.jit, static_argnames=("block_b",))
def latent_classifier(z, w1, b1, gamma, beta, w2, b2, *, block_b=None):
    """Eval-mode forward of LatentClassifier.

    z: (B, D); w1: (D, H); b1/gamma/beta: (1, H); w2: (H, 1); b2: (1, 1).
    Returns (B, 1) float32 probabilities.
    """
    B, D = z.shape
    H = w1.shape[1]

    if block_b is None:
        tb, num_tiles = _choose_batch_tile(B, D)
    else:
        tb = min(int(block_b), B)                    # expert override (mult. of 128)
        num_tiles = -(-B // tb)

    # Small, one-time weight relayouts (negligible next to streaming z).
    w1t = w1.T                      # (H, D)
    b1c = b1.reshape(H, 1)
    gc = gamma.reshape(H, 1)
    bc = beta.reshape(H, 1)
    w2c = w2.reshape(H, 1)
    b2s = b2.reshape(1, 1)

    # Scoped-VMEM request: double-buffered z tile + double-buffered resident
    # params + f32 body temporaries, with headroom; clamped to a range that is
    # legal on every generation (>= 16 MiB v5e default, <= 48 MiB < v7x's
    # 64 MiB physical VMEM).
    lane = 128
    d_pad = -(-D // lane) * lane
    h_pad = -(-H // 8) * 8
    need = 4 * (2 * tb * d_pad            # z tile, double-buffered (lane-padded)
                + 2 * h_pad * d_pad       # w1^T, double-buffered
                + 8 * h_pad * tb          # (H, TB) f32 temporaries in the body
                + 4 * tb + 4096)
    vmem_limit = int(min(max(need + (4 << 20), 16 << 20), 48 << 20))

    # NOTE: when num_tiles * tb > B the trailing z block reads garbage rows;
    # each output column depends only on its own z row and the pipeline drops
    # out-of-range output columns, so the (1, B) result below is exact (any
    # NaN/Inf produced in those discarded lanes is harmless).
    out = pl.pallas_call(
        _latent_classifier_kernel,
        out_shape=jax.ShapeDtypeStruct((1, B), jnp.float32),
        grid_spec=pltpu.PrefetchScalarGridSpec(
            num_scalar_prefetch=0,
            grid=(num_tiles,),
            in_specs=[
                # z streamed in natural layout; default double buffering.
                pl.BlockSpec((tb, D), lambda i: (i, 0)),
                pl.BlockSpec((H, D), lambda i: (0, 0)),             # w1^T (resident)
                pl.BlockSpec((H, 1), lambda i: (0, 0)),             # b1
                pl.BlockSpec((H, 1), lambda i: (0, 0)),             # LN gamma
                pl.BlockSpec((H, 1), lambda i: (0, 0)),             # LN beta
                pl.BlockSpec((H, 1), lambda i: (0, 0)),             # w2
                pl.BlockSpec(memory_space=pltpu.MemorySpace.SMEM),  # b2 scalar
            ],
            out_specs=pl.BlockSpec((1, tb), lambda i: (0, i)),
        ),
        compiler_params=pltpu.CompilerParams(
            # Independent batch tiles -> megacore-shardable on v7x.
            dimension_semantics=("parallel",),
            vmem_limit_bytes=vmem_limit,
        ),
    )(z, w1t, b1c, gc, bc, w2c, b2s)

    return out.reshape(B, 1)


def init_params(key, latent_dim):
    """Deterministic synthetic init mimicking nn.Linear's U(-1/sqrt(fan_in), +)."""
    hidden = latent_dim // 2
    k1, k2, k3, k4 = jax.random.split(key, 4)
    bound1 = 1.0 / jnp.sqrt(jnp.float32(latent_dim))
    bound2 = 1.0 / jnp.sqrt(jnp.float32(hidden))
    w1 = jax.random.uniform(k1, (latent_dim, hidden), jnp.float32, -bound1, bound1)
    b1 = jax.random.uniform(k2, (1, hidden), jnp.float32, -bound1, bound1)
    gamma = jnp.ones((1, hidden), jnp.float32)       # LayerNorm weight
    beta = jnp.zeros((1, hidden), jnp.float32)       # LayerNorm bias
    w2 = jax.random.uniform(k3, (hidden, 1), jnp.float32, -bound2, bound2)
    b2 = jax.random.uniform(k4, (1, 1), jnp.float32, -bound2, bound2)
    return w1, b1, gamma, beta, w2, b2


def reference_forward(z, w1, b1, gamma, beta, w2, b2):
    """Pure-JAX reference for correctness check (eval-mode forward, f32 matmuls)."""
    h = jnp.dot(z, w1, precision=jax.lax.Precision.HIGHEST) + b1
    mean = jnp.mean(h, axis=-1, keepdims=True)
    var = jnp.mean((h - mean) ** 2, axis=-1, keepdims=True)
    hn = (h - mean) / jnp.sqrt(var + _LN_EPS) * gamma + beta
    act = 0.5 * hn * (1.0 + jax.lax.erf(hn / jnp.sqrt(2.0)))
    return jax.nn.sigmoid(jnp.dot(act, w2, precision=jax.lax.Precision.HIGHEST) + b2)


if __name__ == "__main__":
    latent_dim = 32   # -> hidden = 16
    batch = 16

    key = jax.random.PRNGKey(0)
    kz, kp = jax.random.split(key)
    z = jax.random.normal(kz, (batch, latent_dim), jnp.float32)
    params = init_params(kp, latent_dim)

    out = jax.block_until_ready(latent_classifier(z, *params))
    ref = reference_forward(z, *params)

    assert out.shape == (batch, 1)
    # Both the kernel's and the reference's matmuls run at f32 (HIGHEST)
    # precision; remaining drift is transcendental-approximation-level.
    assert jnp.allclose(out, ref, atol=1e-3, rtol=1e-3), (
        f"max abs err {jnp.max(jnp.abs(out - ref))}")

    print("KERNEL_OK")
</pallas_src>

<mosaic_0001>
module attributes {stable_mosaic.version = 11 : i64} {
  func.func @_latent_classifier_kernel(%arg0: i32, %arg1: memref<16x32xf32, #tpu.memory_space<vmem>>, %arg2: memref<16x32xf32, #tpu.memory_space<vmem>>, %arg3: memref<16x1xf32, #tpu.memory_space<vmem>>, %arg4: memref<16x1xf32, #tpu.memory_space<vmem>>, %arg5: memref<16x1xf32, #tpu.memory_space<vmem>>, %arg6: memref<16x1xf32, #tpu.memory_space<vmem>>, %arg7: memref<1x1xf32, #tpu.memory_space<smem>>, %arg8: memref<1x16xf32, #tpu.memory_space<vmem>>) attributes {dimension_semantics = [#tpu.dimension_semantics<parallel>], iteration_bounds = array<i64: 1>, scalar_prefetch = 0 : i64, scratch_operands = 0 : i64, tpu.core_type = #tpu.core_type<tc>, window_params = [{transform_indices = @transform_0, window_bounds = array<i64: 16, 32>}, {pipeline_mode = #tpu.pipeline_mode<synchronous>, transform_indices = @transform_1, window_bounds = array<i64: 16, 32>}, {pipeline_mode = #tpu.pipeline_mode<synchronous>, transform_indices = @transform_2, window_bounds = array<i64: 16, 1>}, {pipeline_mode = #tpu.pipeline_mode<synchronous>, transform_indices = @transform_3, window_bounds = array<i64: 16, 1>}, {pipeline_mode = #tpu.pipeline_mode<synchronous>, transform_indices = @transform_4, window_bounds = array<i64: 16, 1>}, {pipeline_mode = #tpu.pipeline_mode<synchronous>, transform_indices = @transform_5, window_bounds = array<i64: 16, 1>}, {transform_indices = @transform_6, window_bounds = array<i64: 1, 1>}, {transform_indices = @transform_7, window_bounds = array<i64: 1, 16>}]} {
    %c0 = arith.constant 0 : index
    %c0_0 = arith.constant 0 : index
    %0 = vector.load %arg2[%c0, %c0_0] : memref<16x32xf32, #tpu.memory_space<vmem>>, vector<16x32xf32>
    %c0_1 = arith.constant 0 : index
    %c0_2 = arith.constant 0 : index
    %1 = vector.load %arg1[%c0_1, %c0_2] : memref<16x32xf32, #tpu.memory_space<vmem>>, vector<16x32xf32>
    %cst = arith.constant dense<0.000000e+00> : vector<16x16xf32>
    %2 = tpu.matmul %0, %1, %cst {dimension_numbers = #tpu.dot_dimension_numbers<[1], [1], [0], [0], [0, 0, 1, 0], [], []>, precision = #tpu.contract_precision<fp32>} : vector<16x32xf32>, vector<16x32xf32>, vector<16x16xf32> -> vector<16x16xf32>
    %c0_3 = arith.constant 0 : index
    %c0_4 = arith.constant 0 : index
    %3 = vector.load %arg3[%c0_3, %c0_4] : memref<16x1xf32, #tpu.memory_space<vmem>>, vector<16x1xf32>
    %4 = vector.broadcast %3 : vector<16x1xf32> to vector<16x16xf32>
    %5 = arith.addf %2, %4 : vector<16x16xf32>
    %cst_5 = arith.constant dense<0.000000e+00> : vector<16xf32>
    %6 = vector.multi_reduction <add>, %5, %cst_5 [0] : vector<16x16xf32> to vector<16xf32>
    %7 = vector.shape_cast %6 : vector<16xf32> to vector<1x16xf32>
    %cst_6 = arith.constant 1.600000e+01 : f32
    %8 = vector.broadcast %cst_6 : f32 to vector<1x16xf32>
    %9 = arith.divf %7, %8 : vector<1x16xf32>
    %10 = vector.broadcast %9 : vector<1x16xf32> to vector<16x16xf32>
    %11 = arith.subf %5, %10 : vector<16x16xf32>
    %12 = arith.mulf %11, %11 : vector<16x16xf32>
    %cst_7 = arith.constant dense<0.000000e+00> : vector<16xf32>
    %13 = vector.multi_reduction <add>, %12, %cst_7 [0] : vector<16x16xf32> to vector<16xf32>
    %14 = vector.shape_cast %13 : vector<16xf32> to vector<1x16xf32>
    %cst_8 = arith.constant 1.600000e+01 : f32
    %15 = vector.broadcast %cst_8 : f32 to vector<1x16xf32>
    %16 = arith.divf %14, %15 : vector<1x16xf32>
    %cst_9 = arith.constant 9.99999974E-6 : f32
    %17 = vector.broadcast %cst_9 : f32 to vector<1x16xf32>
    %18 = arith.addf %16, %17 : vector<1x16xf32>
    %19 = math.rsqrt %18 : vector<1x16xf32>
    %20 = vector.broadcast %19 : vector<1x16xf32> to vector<16x16xf32>
    %21 = arith.mulf %11, %20 : vector<16x16xf32>
    %c0_10 = arith.constant 0 : index
    %c0_11 = arith.constant 0 : index
    %22 = vector.load %arg4[%c0_10, %c0_11] : memref<16x1xf32, #tpu.memory_space<vmem>>, vector<16x1xf32>
    %23 = vector.broadcast %22 : vector<16x1xf32> to vector<16x16xf32>
    %24 = arith.mulf %21, %23 : vector<16x16xf32>
    %c0_12 = arith.constant 0 : index
    %c0_13 = arith.constant 0 : index
    %25 = vector.load %arg5[%c0_12, %c0_13] : memref<16x1xf32, #tpu.memory_space<vmem>>, vector<16x1xf32>
    %26 = vector.broadcast %25 : vector<16x1xf32> to vector<16x16xf32>
    %27 = arith.addf %24, %26 : vector<16x16xf32>
    %cst_14 = arith.constant 5.000000e-01 : f32
    %28 = vector.broadcast %cst_14 : f32 to vector<16x16xf32>
    %29 = arith.mulf %28, %27 : vector<16x16xf32>
    %cst_15 = arith.constant 0.707106769 : f32
    %30 = vector.broadcast %cst_15 : f32 to vector<16x16xf32>
    %31 = arith.mulf %27, %30 : vector<16x16xf32>
    %32 = math.erf %31 : vector<16x16xf32>
    %cst_16 = arith.constant 1.000000e+00 : f32
    %33 = vector.broadcast %cst_16 : f32 to vector<16x16xf32>
    %34 = arith.addf %33, %32 : vector<16x16xf32>
    %35 = arith.mulf %29, %34 : vector<16x16xf32>
    %c0_17 = arith.constant 0 : index
    %c0_18 = arith.constant 0 : index
    %36 = vector.load %arg6[%c0_17, %c0_18] : memref<16x1xf32, #tpu.memory_space<vmem>>, vector<16x1xf32>
    %37 = vector.broadcast %36 : vector<16x1xf32> to vector<16x16xf32>
    %38 = arith.mulf %35, %37 : vector<16x16xf32>
    %cst_19 = arith.constant dense<0.000000e+00> : vector<16xf32>
    %39 = vector.multi_reduction <add>, %38, %cst_19 [0] : vector<16x16xf32> to vector<16xf32>
    %40 = vector.shape_cast %39 : vector<16xf32> to vector<1x16xf32>
    %c0_20 = arith.constant 0 : index
    %c0_21 = arith.constant 0 : index
    %41 = memref.load %arg7[%c0_20, %c0_21] : memref<1x1xf32, #tpu.memory_space<smem>>
    %42 = vector.broadcast %41 : f32 to vector<1x16xf32>
    %43 = arith.addf %40, %42 : vector<1x16xf32>
    %44 = arith.negf %43 : vector<1x16xf32>
    %45 = math.exp %44 : vector<1x16xf32>
    %cst_22 = arith.constant 1.000000e+00 : f32
    %46 = vector.broadcast %cst_22 : f32 to vector<1x16xf32>
    %47 = arith.addf %46, %45 : vector<1x16xf32>
    %48 = arith.divf %46, %47 : vector<1x16xf32>
    %c0_23 = arith.constant 0 : index
    %c0_24 = arith.constant 0 : index
    %49 = vector.load %arg8[%c0_23, %c0_24] : memref<1x16xf32, #tpu.memory_space<vmem>>, vector<1x16xf32>
    tpu.vector_store %arg8[%c0_23, %c0_24], %48 {strides = array<i32>} : memref<1x16xf32, #tpu.memory_space<vmem>>, vector<1x16xf32>,
    return
  }
  func.func @transform_0(%arg0: i32) -> (i32, i32) {
    %c0_i32 = arith.constant 0 : i32
    %c0_i32_0 = arith.constant 0 : i32
    return %arg0, %c0_i32 : i32, i32
  }
  func.func @transform_1(%arg0: i32) -> (i32, i32) {
    %c0_i32 = arith.constant 0 : i32
    %c0_i32_0 = arith.constant 0 : i32
    %c0_i32_1 = arith.constant 0 : i32
    return %c0_i32, %c0_i32_0 : i32, i32
  }
  func.func @transform_2(%arg0: i32) -> (i32, i32) {
    %c0_i32 = arith.constant 0 : i32
    %c0_i32_0 = arith.constant 0 : i32
    %c0_i32_1 = arith.constant 0 : i32
    return %c0_i32, %c0_i32_0 : i32, i32
  }
  func.func @transform_3(%arg0: i32) -> (i32, i32) {
    %c0_i32 = arith.constant 0 : i32
    %c0_i32_0 = arith.constant 0 : i32
    %c0_i32_1 = arith.constant 0 : i32
    return %c0_i32, %c0_i32_0 : i32, i32
  }
  func.func @transform_4(%arg0: i32) -> (i32, i32) {
    %c0_i32 = arith.constant 0 : i32
    %c0_i32_0 = arith.constant 0 : i32
    %c0_i32_1 = arith.constant 0 : i32
    return %c0_i32, %c0_i32_0 : i32, i32
  }
  func.func @transform_5(%arg0: i32) -> (i32, i32) {
    %c0_i32 = arith.constant 0 : i32
    %c0_i32_0 = arith.constant 0 : i32
    %c0_i32_1 = arith.constant 0 : i32
    return %c0_i32, %c0_i32_0 : i32, i32
  }
  func.func @transform_6(%arg0: i32) -> (i32, i32) {
    %c0_i32 = arith.constant 0 : i32
    %c0_i32_0 = arith.constant 0 : i32
    %c0_i32_1 = arith.constant 0 : i32
    return %c0_i32, %c0_i32_0 : i32, i32
  }
  func.func @transform_7(%arg0: i32) -> (i32, i32) {
    %c0_i32 = arith.constant 0 : i32
    %c0_i32_0 = arith.constant 0 : i32
    return %c0_i32, %arg0 : i32, i32
  }
}

</mosaic_0001>

<bundles_post_ra>
// kernel: latent_classifier.1
= control target key start
LH: loop header
LB: loop body
LE: loop exit
PB: predicated region body
PF: predicated region fallthrough
CT: control target
= control target key end

     0   :  { %vm44_vm0 = vcmask 261120   ;;  %v816_v7 = vmov 0   ;;  %s915_s0 = inlined_call_operand.vmem [shape: f32[16,32], index: 0, kind: input, shape index: {}]   ;;  %s916_s1 = inlined_call_operand.vmem [shape: f32[16,32], index: 1, kind: input, shape index: {}]   ;;  %s917_s2 = inlined_call_operand.vmem [shape: f32[16,1], index: 2, kind: input, shape index: {}]   ;;  %s918_s3 = inlined_call_operand.vmem [shape: f32[16,1], index: 3, kind: input, shape index: {}]   ;;  %s919_s4 = inlined_call_operand.vmem [shape: f32[16,1], index: 4, kind: input, shape index: {}]   ;;  %s920_s5 = inlined_call_operand.vmem [shape: f32[16,1], index: 5, kind: input, shape index: {}]   ;;  %s921_s6 = inlined_call_operand.<no memory space> [shape: f32[1,1], index: 6, kind: input, shape index: {}]   ;;  %s922_s7 = inlined_call_operand.hbm [shape: f32[1,16], index: 7, kind: output, shape index: {}]  }
   0x1   :  { %v30_v0 = vld [vmem:[%s915_s0] sm:$0xff]  ;;  %v31_v1 = vld [vmem:[%s915_s0 + $0x8] sm:$0xff]  ;;  %780 = vset.pattern.permute.xlu0 %v816_v7  ;;  %781 = vset.pattern.permute.xlu1 %v816_v7 }
   0x2   :  { %v28_v2 = vld [vmem:[%s916_s1] sm:$0xff]  ;;  %v52_v3 = vsel %vm44_vm0, %v30_v0, 0  ;;  %v55_v4 = vsel %vm44_vm0, %v31_v1, 0  ;;  %v29_v6 = vld [vmem:[%s916_s1 + $0x8] sm:$0xff] }
   0x3   :  { %v46_v5 = vsel %vm44_vm0, %v28_v2, 0  ;;  %v32_v8 = vld [vmem:[%s917_s2] sm:$0xff]  ;;  %v58_v9 = vand.u32 4294901760, %v52_v3  ;;  %v61_v10 = vand.u32 4294901760, %v55_v4  ;;  %v49_v12 = vsel %vm44_vm0, %v29_v6, 0 }
   0x4   :  { %v124_v11 = vand.u32 4294901760, %v46_v5  ;;  %36 = vperm.xlu0 %780, %v32_v8   ;;  %v134_v13 = vand.u32 4294901760, %v49_v12  ;;  %v589_v14 = vld [vmem:[%s918_s3] sm:$0xff] }
   0x5   :  { %v742_v15 = vpack.c.bf16 %v61_v10, %v58_v9  ;;  %v146_v17 = vsub.f32 %v52_v3, %v58_v9  ;;  %v153_v18 = vsub.f32 %v55_v4, %v61_v10  ;;  %593 = vperm.xlu1 %781, %v589_v14  }
   0x6   :  { %v125_v16 = vsub.f32 %v46_v5, %v124_v11 }
   0x7   :  { %13 = vsyncpa [#allocation4], 0  ;;  %v135_v19 = vsub.f32 %v49_v12, %v134_v13  ;;  %743 = vmatprep.subr.bf16.mxu1 %v742_v15  ;;  %755 = vmatprep.subr.bf16.mxu0 %v742_v15  ;;  %v147_v21 = vand.u32 4294901760, %v146_v17  ;;  %v154_v22 = vand.u32 4294901760, %v153_v18  ;;  %v33_v23 = vld [vmem:[%s917_s2 + $0x8] sm:$0xff]  ;;  %v603_v34 = vld [vmem:[%s919_s4] sm:$0xff]  ;;  %v750_v38 = vpack.c.bf16 %v153_v18, %v146_v17 }
   0x8   :  { %v126_v20 = vand.u32 4294901760, %v125_v16  ;;  %v590_v24 = vld [vmem:[%s918_s3 + $0x8] sm:$0xff]  ;;  %745 = vmatpush3.bf16.xpose.msra.mxu1 %v742_v15  ;;  %757 = vmatpush3.bf16.xpose.msra.mxu0 %v742_v15  ;;  %v627_v39 = vld [vmem:[%s920_s5] sm:$0xff]  ;;  %vm559_vm1 = vcmask 130048   ;;  %s817_s21 = smov [#allocation3]   ;;  %vm659_vm2 = vcmask 122880  }
   0x9   :  { %v136_v25 = vand.u32 4294901760, %v135_v19  ;;  %v148_v27 = vsub.f32 %v146_v17, %v147_v21  ;;  %v155_v28 = vsub.f32 %v153_v18, %v154_v22  ;;  %v758_v29 = vpack.c.bf16 %v154_v22, %v147_v21  ;;  %41 = vperm.xlu0 %780, %v33_v23   ;;  %598 = vperm.xlu1 %781, %v590_v24   ;;  %v604_v35 = vld [vmem:[%s919_s4 + $0x8] sm:$0xff]  ;;  %s667_s22 = sshll.u32 %s817_s21, 4  ;;  %s668_s22 = int_to_ptr.vmem [resolvable:$true] %s667_s22 }
   0xa   :  { %v127_v26 = vsub.f32 %v125_v16, %v126_v20  ;;  %725 = vmatprep.mubr.f32.mxu0 %v126_v20  ;;  %v628_v40 = vld [vmem:[%s920_s5 + $0x8] sm:$0xff]  ;;  %s792_s23 = scalar_lea.vmem %s668_s22, 16  ;;  %s796_s24 = scalar_lea.vmem %s668_s22, 32 }
   0xb   :  { %v137_v30 = vsub.f32 %v135_v19, %v136_v25  ;;  %v149_v32 = vand.u32 4294901760, %v148_v27  ;;  %v156_v33 = vand.u32 4294901760, %v155_v28  ;;  %759 = vmatprep.subr.bf16.mxu0 %v758_v29  ;;  %p793_p0 = scmp.ne.s32.totalorder %s668_s22, %s792_s23  ;;  %p797_p1 = scmp.lt.s32.totalorder %s668_s22, %s668_s22 }
   0xc   :  { %v128_v31 = vand.u32 4294901760, %v127_v26  ;;  %p798_p2 = scmp.lt.s32.totalorder %s796_s24, %s792_s23 }
   0xd   :  { %v138_v36 = vand.u32 4294901760, %v137_v30  ;;  %v746_v37 = vpack.c.bf16 %v156_v33, %v149_v32  ;;  %607 = vperm.xlu0 %780, %v603_v34   ;;  %612 = vperm.xlu1 %781, %v604_v35  }
   0xe   :  { %704 = vmatprep.mubr.f32.mxu1 %v128_v31  ;;  %p799_p3 = por %p798_p2, %p797_p1 }
   0xf   :  { %705 = vmatmul.mubr.f32.vlgmr.msra.gmra.mrb[0].mxu1 %v138_v36  ;;  %747 = vmatprep.subr.bf16.mxu1 %v746_v37 }
  0x10   :  { %726 = vmatmul.mubr.f32.vlgmr.msra.gmra.mrb[0].mxu0 %v136_v25  ;;  %749 = vmatpush3.bf16.xpose.msra.mxu1 %v746_v37  ;;  %p800_p4 = pnand %p799_p3, %p793_p0 }
  0x11   :  { %761 = vmatpush3.bf16.xpose.msra.mxu0 %v758_v29  ;;  %711 = vmatprep.mubr.f32.mxu1 %v124_v11 }
  0x12   :  { %732 = vmatprep.mubr.f32.mxu0 %v124_v11  ;;  %751 = vmatprep.subr.bf16.mxu1 %v750_v38 }
  0x13   :  { %763 = vmatprep.subr.bf16.mxu0 %v742_v15  ;;  %631 = vperm.xlu0 %780, %v627_v39  }
  0x14   :  { %636 = vperm.xlu1 %781, %v628_v40  }
  0x17   :  { %712 = vmatmul.mubr.f32.vlgmr.msra.gmra.mrb[0].mxu1 %v134_v13 }
  0x18   :  { %733 = vmatmul.mubr.f32.vlgmr.msra.gmra.mrb[0].mxu0 %v134_v13  ;;  %753 = vmatpush3.bf16.xpose.msra.mxu1 %v750_v38 }
  0x19   :  { %765 = vmatpush3.bf16.xpose.msra.mxu0 %v742_v15  ;;  %718 = vmatprep.mubr.f32.mxu1 %v125_v16 }
  0x1a   :  { %739 = vmatprep.mubr.f32.mxu0 %v124_v11 }
  0x1f   :  { %719 = vmatmul.mubr.f32.vlgmr.msra.gmra.mrb[0].mxu1 %v135_v19 }
  0x20   :  { %740 = vmatmul.mubr.f32.vlgmr.msra.gmra.mrb[0].mxu0 %v134_v13 }
  0x83   :  { %v37_v41 = vpop.permute.xlu0 %36 }
  0x84   :  { %v594_v12 = vpop.permute.xlu1 %593 }
  0x88   :  { %v42_v42 = vpop.permute.xlu0 %41  ;;  %v599_v13 = vpop.permute.xlu1 %598 }
  0x8c   :  { %v608_v19 = vpop.permute.xlu0 %607  ;;  %v613_v20 = vpop.permute.xlu1 %612 }
  0x92   :  { %v632_v32 = vpop.permute.xlu0 %631 }
  0x93   :  { %v637_v34 = vpop.permute.xlu1 %636 }
  0xf2   :  { %v720_v43 = vpop.f32.mrb[0].mxu1 }
  0xf3   :  { %v766_v44 = vadd.f32 %v720_v43, %v42_v42  ;;  %v741_v45 = vpop.f32.mrb[0].mxu0  ;;  %v303_v46 = vpop.f32.mrb[1].mxu1 }
  0xf4   :  { %v768_v47 = vadd.f32 %v303_v46, %v37_v41  ;;  %v549_v48 = vpop.f32.mrb[1].mxu0 }
  0xf5   :  { %v767_v49 = vadd.f32 %v766_v44, %v741_v45  ;;  %v651_v45 = vstv %s921_s6 }
  0xf6   :  { %v769_v50 = vadd.f32 %v768_v47, %v549_v48 }
  0xf7   :  { %v561_v51 = vsel %vm559_vm1, %v767_v49, 0.0 }
  0xf8   :  { %v560_v52 = vsel %vm559_vm1, %v769_v50, 0.0 }
  0xf9   :  { %v562_v53 = vadd.f32 %v561_v51, %v560_v52 }
  0xfb   :  { %v563_v54 = vrot.slane %v562_v53, 4 }
  0xfd   :  { %v564_v55 = vadd.f32 %v563_v54, %v562_v53 }
  0xff   :  { %v565_v56 = vrot.slane %v564_v55, 2 }
 0x101   :  { %v566_v57 = vadd.f32 %v565_v56, %v564_v55 }
 0x103   :  { %v567_v58 = vrot.slane %v566_v57, 1 }
 0x105   :  { %v568_v59 = vadd.f32 %v567_v58, %v566_v57 }
 0x107   :  { %v570_v60 = vmul.f32 0.0625, %v568_v59 }
 0x109   :  { %v571_v61 = vsub.f32 %v769_v50, %v570_v60  ;;  %v572_v62 = vsub.f32 %v767_v49, %v570_v60 }
 0x10b   :  { %v573_v63 = vmul.f32 %v571_v61, %v571_v61  ;;  %v574_v0 = vmul.f32 %v572_v62, %v572_v62 }
 0x10d   :  { %v575_v1 = vsel %vm559_vm1, %v573_v63, 0.0  ;;  %v576_v2 = vsel %vm559_vm1, %v574_v0, 0.0 }
 0x10e   :  { %v577_v3 = vadd.f32 %v576_v2, %v575_v1 }
 0x110   :  { %v578_v4 = vrot.slane %v577_v3, 4 }
 0x112   :  { %v579_v5 = vadd.f32 %v578_v4, %v577_v3 }
 0x114   :  { %v580_v6 = vrot.slane %v579_v5, 2 }
 0x116   :  { %v581_v7 = vadd.f32 %v580_v6, %v579_v5 }
 0x118   :  { %v582_v8 = vrot.slane %v581_v7, 1 }
 0x11a   :  { %v583_v9 = vadd.f32 %v582_v8, %v581_v7 }
 0x11c   :  { %v584_v10 = vmul.f32 0.0625, %v583_v9 }
 0x11e   :  { %v585_v11 = vadd.f32 1e-05, %v584_v10 }
 0x120   :  { %782 = vrsqrt.f32 %v585_v11 }
 0x12a   :  { %v783_v14 = vpop.eup %782 }
 0x12b   :  { %v587_v15 = vmul.f32 %v783_v14, %v571_v61  ;;  %v588_v16 = vmul.f32 %v783_v14, %v572_v62 }
 0x12d   :  { %v601_v17 = vmul.f32 %v594_v12, %v587_v15  ;;  %v602_v18 = vmul.f32 %v599_v13, %v588_v16 }
 0x12f   :  { %v615_v21 = vadd.f32 %v608_v19, %v601_v17  ;;  %v616_v22 = vadd.f32 %v613_v20, %v602_v18 }
 0x131   :  { %v619_v23 = vmul.f32 0.70710677, %v615_v21  ;;  %v620_v24 = vmul.f32 0.70710677, %v616_v22  ;;  %v617_v27 = vmul.f32 0.5, %v615_v21  ;;  %v618_v29 = vmul.f32 0.5, %v616_v22 }
 0x133   :  { %784 = verf.f32 %v619_v23 }
 0x134   :  { %786 = verf.f32 %v620_v24 }
 0x13d   :  { %v785_v25 = vpop.eup %784 }
 0x13e   :  { %v787_v26 = vpop.eup %786  ;;  %v623_v28 = vadd.f32 1.0, %v785_v25 }
 0x13f   :  { %v624_v30 = vadd.f32 1.0, %v787_v26 }
 0x140   :  { %v625_v31 = vmul.f32 %v623_v28, %v617_v27 }
 0x141   :  { %v626_v33 = vmul.f32 %v624_v30, %v618_v29 }
 0x142   :  { %v639_v35 = vmul.f32 %v632_v32, %v625_v31 }
 0x143   :  { %v640_v36 = vmul.f32 %v637_v34, %v626_v33 }
 0x144   :  { %v641_v37 = vsel %vm559_vm1, %v639_v35, 0.0 }
 0x145   :  { %v642_v38 = vsel %vm559_vm1, %v640_v36, 0.0 }
 0x146   :  { %v643_v39 = vadd.f32 %v642_v38, %v641_v37 }
 0x148   :  { %v644_v40 = vrot.slane %v643_v39, 4 }
 0x14a   :  { %v645_v41 = vadd.f32 %v644_v40, %v643_v39 }
 0x14c   :  { %v646_v42 = vrot.slane %v645_v41, 2 }
 0x14e   :  { %v647_v43 = vadd.f32 %v646_v42, %v645_v41 }
 0x150   :  { %v648_v44 = vrot.slane %v647_v43, 1 }
 0x152   :  { %v649_v46 = vadd.f32 %v648_v44, %v647_v43 }
 0x154   :  { %v652_v47 = vadd.f32 %v651_v45, %v649_v46 }
 0x156   :  { %v675_v48 = vmul.f32 -1.442695, %v652_v47 }
 0x158   :  { %788 = vpow2.f32 %v675_v48 }
 0x162   :  { %v789_v49 = vpop.eup %788 }
 0x163   :  { %v656_v50 = vadd.f32 1.0, %v789_v49 }
 0x165   :  { %790 = vrcp.f32 %v656_v50 }
 0x16f   :  { %v791_v51 = vpop.eup %790 }
 0x170   :  { %660 = vst.msk [vmem:[#allocation3] sm:$0x1] %vm659_vm2, %v791_v51 }
 0x171   :  { %803 = shalt.err (!%p800_p4)
}
 0x172   :  { %s804_s26 = scalar_lea.hbm %s922_s7, 16 }
 0x173   :  { %p805_p5 = scmp.ne.s32.totalorder %s922_s7, %s804_s26  ;;  %p808_p6 = scmp.lt.u32.totalorder %s804_s26, %s922_s7 }
 0x175   :  { %p810_p7 = pnand %p808_p6, %p805_p5 }
 0x177   :  { %813 = shalt.err (!%p810_p7)
}
 0x178   :  { %670 = dma.vmem_to_hbm [thread:$0]  %s668_s22, 16, %s922_s7, [#allocation4]  }
 0x179   :  { %814 = dma.done.wait [#allocation4], 16  }
 0x17a   :  { %815 = vsyncadd [#allocation4], 4294967280 }
 0x17b   :  { %674 = vsyncpa [#allocation4], 1 }

</bundles_post_ra>
